<compile_context>
chip_gen: v7x
topology: tpu7x:2x2x1
jax: 0.10.0
libtpu: 0.0.40
codegen_flags: <defaults>
</compile_context>

<pallas_src>
import functools
import math

import jax
import jax.numpy as jnp
from jax.experimental import pallas as pl
from jax.experimental.pallas import tpu as pltpu


def msa_kernel(x_ref, w_ref, b_ref, o_ref, *, n_heads, d_head):
    # x_ref: (1, N, d)   one full sequence, all heads
    # w_ref: (d, 3*d)    fused pre-transposed block-diagonal [Wq*scale | Wk | Wv]
    # b_ref: (1, 3*d)    fused bias [bq*scale | bk | bv]
    # o_ref: (1, N, d)   lane-dense output block
    seq = x_ref[0]                                    # (N, d)
    d = n_heads * d_head

    # Single fused QKV projection for all heads: (N, d) @ (d, 3d) + (1, 3d)
    qkv = jnp.dot(seq, w_ref[...], preferred_element_type=jnp.float32) + b_ref[...]

    head_outs = []
    for h in range(n_heads):                          # static unrolled loop
        lo = h * d_head
        hi = lo + d_head
        q = qkv[:, lo:hi]                             # already scaled by 1/sqrt(dh)
        k = qkv[:, d + lo:d + hi]
        v = qkv[:, 2 * d + lo:2 * d + hi]

        # scores = q @ k^T without an explicit in-kernel transpose of k
        scores = jax.lax.dot_general(
            q, k, (((1,), (1,)), ((), ())),
            preferred_element_type=jnp.float32)       # (N, N)

        # numerically stable softmax, normalization deferred past the PV matmul
        scores = scores - jnp.max(scores, axis=-1, keepdims=True)
        e = jnp.exp(scores)
        denom = jnp.sum(e, axis=-1, keepdims=True)    # (N, 1)
        pv = jnp.dot(e, v, preferred_element_type=jnp.float32)   # (N, dh)
        head_outs.append(pv * pl.reciprocal(denom, approx=False))

    # single lane-dense (N, d) store (== torch.hstack over heads)
    o_ref[0] = jnp.concatenate(head_outs, axis=-1).astype(o_ref.dtype)


def my_msa(x, wq, bq, wk, bk, wv, bv, n_heads):
    """x: (B, N, d); w*: (n_heads, d_head, d_head) torch (out,in) layout; b*: (n_heads, d_head)."""
    B, N, d = x.shape
    dh = d // n_heads
    scale = 1.0 / math.sqrt(dh)

    # Host-side one-time prep: pre-transposed block-diagonal fused weight (d, 3d),
    # fused bias (1, 3d).  Q columns carry the 1/sqrt(dh) scale.
    def blockdiag_T(w, s=1.0):
        out = jnp.zeros((d, d), dtype=jnp.float32)
        for h in range(n_heads):
            out = out.at[h * dh:(h + 1) * dh, h * dh:(h + 1) * dh].set(w[h].T * s)
        return out

    w_fused = jnp.concatenate(
        [blockdiag_T(wq, scale), blockdiag_T(wk), blockdiag_T(wv)], axis=1)   # (d, 3d)
    b_fused = jnp.concatenate(
        [bq.reshape(-1) * scale, bk.reshape(-1), bv.reshape(-1)]).reshape(1, 3 * d)

    kernel = functools.partial(msa_kernel, n_heads=n_heads, d_head=dh)

    return pl.pallas_call(
        kernel,
        out_shape=jax.ShapeDtypeStruct((B, N, d), x.dtype),
        grid_spec=pltpu.PrefetchScalarGridSpec(
            num_scalar_prefetch=0,
            grid=(B,),
            in_specs=[
                pl.BlockSpec((1, N, d), lambda b: (b, 0, 0)),       # x
                pl.BlockSpec((d, 3 * d), lambda b: (0, 0)),          # fused weight (resident)
                pl.BlockSpec((1, 3 * d), lambda b: (0, 0)),          # fused bias   (resident)
            ],
            out_specs=pl.BlockSpec((1, N, d), lambda b: (b, 0, 0)),
        ),
        compiler_params=pltpu.CompilerParams(
            dimension_semantics=("parallel",)),
    )(x, w_fused, b_fused)


def my_msa_ref(x, wq, bq, wk, bk, wv, bv, n_heads):
    """Pure-JAX reference mirroring the PyTorch loop semantics."""
    B, N, d = x.shape
    dh = d // n_heads
    outs = []
    for b in range(B):
        head_outs = []
        for h in range(n_heads):
            seq = x[b, :, h * dh:(h + 1) * dh]
            q = seq @ wq[h].T + bq[h]
            k = seq @ wk[h].T + bk[h]
            v = seq @ wv[h].T + bv[h]
            a = jax.nn.softmax(q @ k.T / math.sqrt(dh), axis=-1)
            head_outs.append(a @ v)
        outs.append(jnp.concatenate(head_outs, axis=-1))
    return jnp.stack(outs, axis=0)


if __name__ == "__main__":
    B, N, d, n_heads = 2, 8, 32, 2
    dh = d // n_heads

    key = jax.random.PRNGKey(0)
    kx, kwq, kbq, kwk, kbk, kwv, kbv = jax.random.split(key, 7)

    # Deterministic synthetic parameters (torch nn.Linear uses uniform(-1/sqrt(in), 1/sqrt(in))).
    bound = 1.0 / math.sqrt(dh)
    x = jax.random.normal(kx, (B, N, d), dtype=jnp.float32)
    wq = jax.random.uniform(kwq, (n_heads, dh, dh), jnp.float32, -bound, bound)
    bq = jax.random.uniform(kbq, (n_heads, dh), jnp.float32, -bound, bound)
    wk = jax.random.uniform(kwk, (n_heads, dh, dh), jnp.float32, -bound, bound)
    bk = jax.random.uniform(kbk, (n_heads, dh), jnp.float32, -bound, bound)
    wv = jax.random.uniform(kwv, (n_heads, dh, dh), jnp.float32, -bound, bound)
    bv = jax.random.uniform(kbv, (n_heads, dh), jnp.float32, -bound, bound)

    out = my_msa(x, wq, bq, wk, bk, wv, bv, n_heads)
    out = jax.block_until_ready(out)

    ref = my_msa_ref(x, wq, bq, wk, bk, wv, bv, n_heads)
    assert out.shape == (B, N, d)
    assert jnp.allclose(out, ref, atol=1e-4, rtol=1e-4), "mismatch vs reference"

    print("KERNEL_OK")
</pallas_src>

<mosaic_0001>
module attributes {stable_mosaic.version = 11 : i64} {
  func.func @msa_kernel(%arg0: i32, %arg1: memref<1x8x32xf32, #tpu.memory_space<vmem>>, %arg2: memref<32x96xf32, #tpu.memory_space<vmem>>, %arg3: memref<1x96xf32, #tpu.memory_space<vmem>>, %arg4: memref<1x8x32xf32, #tpu.memory_space<vmem>>) attributes {dimension_semantics = [#tpu.dimension_semantics<parallel>], iteration_bounds = array<i64: 2>, scalar_prefetch = 0 : i64, scratch_operands = 0 : i64, tpu.core_type = #tpu.core_type<tc>, window_params = [{transform_indices = @transform_0, window_bounds = array<i64: 1, 8, 32>}, {pipeline_mode = #tpu.pipeline_mode<synchronous>, transform_indices = @transform_1, window_bounds = array<i64: 32, 96>}, {pipeline_mode = #tpu.pipeline_mode<synchronous>, transform_indices = @transform_2, window_bounds = array<i64: 1, 96>}, {transform_indices = @transform_3, window_bounds = array<i64: 1, 8, 32>}]} {
    %c0 = arith.constant 0 : index
    %c0_0 = arith.constant 0 : index
    %c0_1 = arith.constant 0 : index
    %0 = vector.load %arg1[%c0, %c0_0, %c0_1] : memref<1x8x32xf32, #tpu.memory_space<vmem>>, vector<1x8x32xf32>
    %1 = vector.shape_cast %0 : vector<1x8x32xf32> to vector<8x32xf32>
    %c0_2 = arith.constant 0 : index
    %c0_3 = arith.constant 0 : index
    %2 = vector.load %arg2[%c0_2, %c0_3] : memref<32x96xf32, #tpu.memory_space<vmem>>, vector<32x96xf32>
    %cst = arith.constant dense<0.000000e+00> : vector<8x96xf32>
    %3 = tpu.matmul %1, %2, %cst {dimension_numbers = #tpu.dot_dimension_numbers<[1], [0], [0], [1], [0, 0, 1, 1], [], []>} : vector<8x32xf32>, vector<32x96xf32>, vector<8x96xf32> -> vector<8x96xf32>
    %c0_4 = arith.constant 0 : index
    %c0_5 = arith.constant 0 : index
    %4 = vector.load %arg3[%c0_4, %c0_5] : memref<1x96xf32, #tpu.memory_space<vmem>>, vector<1x96xf32>
    %5 = vector.broadcast %4 : vector<1x96xf32> to vector<8x96xf32>
    %6 = arith.addf %3, %5 : vector<8x96xf32>
    %7 = vector.extract_strided_slice %6 {offsets = [0, 0], sizes = [8, 16], strides = [1, 1]} : vector<8x96xf32> to vector<8x16xf32>
    %8 = vector.extract_strided_slice %6 {offsets = [0, 32], sizes = [8, 16], strides = [1, 1]} : vector<8x96xf32> to vector<8x16xf32>
    %9 = vector.extract_strided_slice %6 {offsets = [0, 64], sizes = [8, 16], strides = [1, 1]} : vector<8x96xf32> to vector<8x16xf32>
    %cst_6 = arith.constant dense<0.000000e+00> : vector<8x8xf32>
    %10 = tpu.matmul %7, %8, %cst_6 {dimension_numbers = #tpu.dot_dimension_numbers<[1], [1], [0], [0], [0, 0, 1, 0], [], []>} : vector<8x16xf32>, vector<8x16xf32>, vector<8x8xf32> -> vector<8x8xf32>
    %cst_7 = arith.constant dense<0xFF800000> : vector<8xf32>
    %11 = vector.multi_reduction <maximumf>, %10, %cst_7 [1] : vector<8x8xf32> to vector<8xf32>
    %12 = vector.shape_cast %11 : vector<8xf32> to vector<8x1xf32>
    %13 = vector.broadcast %12 : vector<8x1xf32> to vector<8x8xf32>
    %14 = arith.subf %10, %13 : vector<8x8xf32>
    %15 = math.exp %14 : vector<8x8xf32>
    %cst_8 = arith.constant dense<0.000000e+00> : vector<8xf32>
    %16 = vector.multi_reduction <add>, %15, %cst_8 [1] : vector<8x8xf32> to vector<8xf32>
    %17 = vector.shape_cast %16 : vector<8xf32> to vector<8x1xf32>
    %cst_9 = arith.constant dense<0.000000e+00> : vector<8x16xf32>
    %18 = tpu.matmul %15, %9, %cst_9 {dimension_numbers = #tpu.dot_dimension_numbers<[1], [0], [0], [1], [0, 0, 1, 1], [], []>} : vector<8x8xf32>, vector<8x16xf32>, vector<8x16xf32> -> vector<8x16xf32>
    %19 = tpu.reciprocal %17 : vector<8x1xf32> -> vector<8x1xf32>
    %20 = vector.broadcast %19 : vector<8x1xf32> to vector<8x16xf32>
    %21 = arith.mulf %18, %20 : vector<8x16xf32>
    %22 = vector.extract_strided_slice %6 {offsets = [0, 16], sizes = [8, 16], strides = [1, 1]} : vector<8x96xf32> to vector<8x16xf32>
    %23 = vector.extract_strided_slice %6 {offsets = [0, 48], sizes = [8, 16], strides = [1, 1]} : vector<8x96xf32> to vector<8x16xf32>
    %24 = vector.extract_strided_slice %6 {offsets = [0, 80], sizes = [8, 16], strides = [1, 1]} : vector<8x96xf32> to vector<8x16xf32>
    %cst_10 = arith.constant dense<0.000000e+00> : vector<8x8xf32>
    %25 = tpu.matmul %22, %23, %cst_10 {dimension_numbers = #tpu.dot_dimension_numbers<[1], [1], [0], [0], [0, 0, 1, 0], [], []>} : vector<8x16xf32>, vector<8x16xf32>, vector<8x8xf32> -> vector<8x8xf32>
    %cst_11 = arith.constant dense<0xFF800000> : vector<8xf32>
    %26 = vector.multi_reduction <maximumf>, %25, %cst_11 [1] : vector<8x8xf32> to vector<8xf32>
    %27 = vector.shape_cast %26 : vector<8xf32> to vector<8x1xf32>
    %28 = vector.broadcast %27 : vector<8x1xf32> to vector<8x8xf32>
    %29 = arith.subf %25, %28 : vector<8x8xf32>
    %30 = math.exp %29 : vector<8x8xf32>
    %cst_12 = arith.constant dense<0.000000e+00> : vector<8xf32>
    %31 = vector.multi_reduction <add>, %30, %cst_12 [1] : vector<8x8xf32> to vector<8xf32>
    %32 = vector.shape_cast %31 : vector<8xf32> to vector<8x1xf32>
    %cst_13 = arith.constant dense<0.000000e+00> : vector<8x16xf32>
    %33 = tpu.matmul %30, %24, %cst_13 {dimension_numbers = #tpu.dot_dimension_numbers<[1], [0], [0], [1], [0, 0, 1, 1], [], []>} : vector<8x8xf32>, vector<8x16xf32>, vector<8x16xf32> -> vector<8x16xf32>
    %34 = tpu.reciprocal %32 : vector<8x1xf32> -> vector<8x1xf32>
    %35 = vector.broadcast %34 : vector<8x1xf32> to vector<8x16xf32>
    %36 = arith.mulf %33, %35 : vector<8x16xf32>
    %37 = tpu.concatenate %21, %36 in 1 : vector<8x16xf32>, vector<8x16xf32> -> vector<8x32xf32>
    %c0_14 = arith.constant 0 : index
    %c0_15 = arith.constant 0 : index
    %c0_16 = arith.constant 0 : index
    %38 = vector.load %arg4[%c0_14, %c0_15, %c0_16] : memref<1x8x32xf32, #tpu.memory_space<vmem>>, vector<1x8x32xf32>
    %39 = vector.shape_cast %38 : vector<1x8x32xf32> to vector<8x32xf32>
    %40 = vector.shape_cast %37 : vector<8x32xf32> to vector<1x8x32xf32>
    tpu.vector_store %arg4[%c0_14, %c0_15, %c0_16], %40 {strides = array<i32>} : memref<1x8x32xf32, #tpu.memory_space<vmem>>, vector<1x8x32xf32>,
    return
  }
  func.func @transform_0(%arg0: i32) -> (i32, i32, i32) {
    %c0_i32 = arith.constant 0 : i32
    %c0_i32_0 = arith.constant 0 : i32
    %c0_i32_1 = arith.constant 0 : i32
    return %arg0, %c0_i32, %c0_i32_0 : i32, i32, i32
  }
  func.func @transform_1(%arg0: i32) -> (i32, i32) {
    %c0_i32 = arith.constant 0 : i32
    %c0_i32_0 = arith.constant 0 : i32
    %c0_i32_1 = arith.constant 0 : i32
    return %c0_i32, %c0_i32_0 : i32, i32
  }
  func.func @transform_2(%arg0: i32) -> (i32, i32) {
    %c0_i32 = arith.constant 0 : i32
    %c0_i32_0 = arith.constant 0 : i32
    %c0_i32_1 = arith.constant 0 : i32
    return %c0_i32, %c0_i32_0 : i32, i32
  }
  func.func @transform_3(%arg0: i32) -> (i32, i32, i32) {
    %c0_i32 = arith.constant 0 : i32
    %c0_i32_0 = arith.constant 0 : i32
    %c0_i32_1 = arith.constant 0 : i32
    return %arg0, %c0_i32, %c0_i32_0 : i32, i32, i32
  }
}

</mosaic_0001>

<bundles_post_ra>
// kernel: tpu_custom_call.1
= control target key start
LH: loop header
LB: loop body
LE: loop exit
PB: predicated region body
PF: predicated region fallthrough
CT: control target
= control target key end

     0   :  { %8 = vsyncpa [#allocation3], 0  ;;  %s1260_s0 = inlined_call_operand.hbm [shape: f32[2,8,32], index: 0, kind: input, shape index: {}]   ;;  %s1261_s1 = inlined_call_operand.hbm [shape: f32[32,96], index: 1, kind: input, shape index: {}]   ;;  %s1262_s2 = inlined_call_operand.vmem [shape: f32[1,96], index: 2, kind: input, shape index: {}]   ;;  %s1263_s3 = inlined_call_operand.hbm [shape: f32[2,8,32], index: 3, kind: output, shape index: {}]  }
   0x1   :  { %10 = vsyncpa [#allocation3 + $0x1], 0 }
   0x2   :  { %11 = vsyncpa [#allocation6], 0 }
   0x3   :  { %12 = vsyncpa [#allocation4], 0 }
   0x4   :  { %14 = vsyncpa [#allocation4 + $0x1], 0  ;;  %s1030_s12 = smov 0   ;;  %s1032_s13 = smov 0  }
   0x5   :  { %s1034_s14 = smov 0   ;;  %s1036_s15 = smov 0  }
   0x6 LB: > { %s1051_s16 = sadd.s32 4294967295, %s994_s15   ;;  %s718_s17 = sadd.s32 4294967294, %s994_s15   ;;  %s994_s15 = sphi %s1036_s15, %s1283_s15   ;;  %s990_s14 = sphi %s1034_s14, %s1282_s14   ;;  %s986_s13 = sphi %s1032_s13, %s1281_s13   ;;  %s982_s12 = sphi %s1030_s12, %s1280_s12  }
   0x7   : > { %p40_p0 = scmp.ne.s32.totalorder %s986_s13, %s982_s12  ;;  %p1264_p1 = scmp.eq.s32.totalorder %s1051_s16, 0 }
   0x8   : > { %p112_p3 = scmp.eq.s32.totalorder %s718_s17, 1  ;;  %p719_p5 = scmp.ge.s32.totalorder %s994_s15, 1 }
   0x9   : > { %p1060_p4 = por %p1264_p1, %p40_p0  ;;  %p119_p7 = scmp.lt.s32.totalorder %s994_s15, 3 }
   0xa   : > { %p1065_p6 = por %p112_p3, %p40_p0  ;;  %s996_s21 = smov [#allocation5]  }
   0xb   : > { %s1267_s18 = scalar_select %p1060_p4, 1, 0 }
   0xc   : > { %s1268_s19 = scalar_select %p1065_p6, 1, 0 }
   0xd   : > { %p1070_p8 = pnand %p719_p5, %p119_p7  ;;  %s131_s22 = sshll.u32 %s996_s21, 4  ;;  %s1074_s22 = int_to_ptr.vmem [resolvable:$true] %s131_s22 }
   0xe   : > { %s1086_s24 = sadd.s32 1, %s994_s15   ;;  %s27_s25 = sadd.s32 1, %s990_s14 }
   0xf   : > { %s1269_s20 = scalar_select %p1070_p8, 1, 0 }
  0x10   : > { %p798_p9 = pneg %p1070_p8  ;;  %s24_s26 = ssub.s32 %s994_s15, %s1086_s24 }
  0x11   : > { %s866_s29 = scalar_lea.hbm %s1261_s1, 512 }
  0x12   : > { %p1081_p11 = pnand %p798_p9, %p1264_p1  ;;  %p867_p12 = scmp.ne.s32.totalorder %s1261_s1, %s866_s29 }
  0x13   : > { %p873_p5 = scmp.lt.u32.totalorder %s866_s29, %s1261_s1 }
  0x14   : > { %p868_p13 = pneg %p1081_p11 }
  0x16   : > { %p869_p0 = pnand %p868_p13, %p867_p12 }
  0x18   : > { %p870_p3 = pneg %p869_p0 }
  0x1a   : > { %p875_p7 = pnand %p873_p5, %p870_p3 }
  0x1c   : > { %878 = shalt.err (!%p875_p7)
}
  0x1d   : > { %s879_s7 = scalar_lea.vmem %s1074_s22, 512  ;;  %p887_p2 = scmp.lt.s32.totalorder %s1074_s22, %s1074_s22 }
  0x1e   : > { %p880_p9 = scmp.ne.s32.totalorder %s1074_s22, %s879_s7  ;;  %p888_p6 = scmp.lt.s32.totalorder %s879_s7, %s879_s7 }
  0x20   : > { %p882_p10 = pnand %p880_p9, %p868_p13  ;;  %p889_p4 = por %p888_p6, %p887_p2 }
  0x22   : > { %p883_p1 = pneg %p882_p10 }
  0x24   : > { %p890_p8 = pnand %p889_p4, %p883_p1 }
  0x26   : > { %893 = shalt.err (!%p890_p8)
}
  0x27   : > { %s997_s8 = smov 128   ;;  %s998_s9 = smov 8  }
  0x28   : > { %801 = dma.hbm_to_vmem [thread:$0]  (!%p1081_p11), %s1261_s1, 512, %s1074_s22, [#allocation6], %s997_s8, %s997_s8, %s998_s9  }
  0x29   : > { %p25_p2 = scmp.eq.s32.totalorder %s24_s26, 0  ;;  %p34_p1 = scmp.ne.s32.totalorder %s990_s14, %s986_s13 }
  0x2a   : > { %p35_p4 = scmp.eq.s32.totalorder %s994_s15, 0  ;;  %p811_p6 = scmp.lt.s32.totalorder %s994_s15, 2 }
  0x2b   : > { %s1117_s17 = scalar_select %p25_p2, %s990_s14, %s27_s25  }
  0x2c   : > { %p36_p8 = por %p35_p4, %p34_p1  ;;  %p1271_p10 = scmp.eq.s32.totalorder %s1051_s16, 1 }
  0x2d   : > { %s148_s27 = sand.u32 1, %s990_s14   ;;  %s723_s28 = sshll.u32 %s994_s15, 7 }
  0x2e   : > { %p1121_p12 = por %p1271_p10, %p34_p1  ;;  %s722_s29 = sshll.u32 %s148_s27, 3 }
  0x2f   : > { %s1130_s4 = scalar_lea.hbm %s1260_s0, %s723_s28  ;;  %s152_s22 = scalar_lea.vmem [#allocation2], %s722_s29 }
  0x30   : > { %s159_s25 = sshll.u32 %s152_s22, 4  ;;  %p1132_p11 = pnand %p811_p6, %p36_p8  ;;  %s1136_s25 = int_to_ptr.vmem [resolvable:$true] %s159_s25 }
  0x31   : > { %s149_s5 = scalar_lea.sflag [#allocation3], %s148_s27  ;;  %s894_s6 = scalar_lea.hbm %s1130_s4, 128 }
  0x32   : > { %p895_p13 = scmp.ne.s32.totalorder %s1130_s4, %s894_s6  ;;  %p896_p0 = pneg %p1132_p11 }
  0x33   : > { %s899_s9 = scalar_lea.hbm %s1260_s0, 256  ;;  %p900_p7 = scmp.lt.u32.totalorder %s1130_s4, %s1260_s0 }
  0x34   : > { %p897_p3 = pnand %p896_p0, %p895_p13  ;;  %p901_p9 = scmp.lt.u32.totalorder %s899_s9, %s894_s6 }
  0x35   : > { %p903_p1 = scmp.lt.u32.totalorder %s894_s6, %s1130_s4 }
  0x36   : > { %p898_p5 = pneg %p897_p3  ;;  %p902_p2 = por %p901_p9, %p900_p7 }
  0x38   : > { %p904_p4 = por %p903_p1, %p902_p2 }
  0x3a   : > { %p905_p6 = pnand %p904_p4, %p898_p5 }
  0x3c   : > { %908 = shalt.err (!%p905_p6)
}
  0x3d   : > { %s909_s27 = scalar_lea.vmem %s1136_s25, 128  ;;  %s999_s28 = smov [#allocation2]  }
  0x3e   : > { %p910_p8 = scmp.ne.s32.totalorder %s1136_s25, %s909_s27  ;;  %s914_s29 = sshll.u32 %s999_s28, 4  ;;  %s915_s29 = int_to_ptr.vmem [resolvable:$false] %s914_s29 }
  0x3f   : > { %s916_s23 = scalar_lea.vmem %s915_s29, 256  ;;  %p917_p3 = scmp.lt.s32.totalorder %s1136_s25, %s915_s29 }
  0x40   : > { %p912_p10 = pnand %p910_p8, %p896_p0  ;;  %p918_p7 = scmp.lt.s32.totalorder %s916_s23, %s909_s27 }
  0x42   : > { %p913_p13 = pneg %p912_p10  ;;  %p919_p9 = por %p918_p7, %p917_p3 }
  0x44   : > { %p920_p2 = pnand %p919_p9, %p913_p13 }
  0x46   : > { %923 = shalt.err (!%p920_p2)
}
  0x47   : > { %805 = dma.hbm_to_vmem [thread:$0]  (!%p1132_p11), %s1130_s4, 128, %s1136_s25, %s149_s5  }
  0x48   : > { %p1274_p5 = scmp.ne.s32.totalorder %s1269_s20, 0 }
  0x49   : > { %s1166_s30 = sand.u32 (!%p1274_p5), 1, %s986_s13   ;;  %p1275_p0 = scmp.ne.s32.totalorder (!%p1274_p5), %s1267_s18, 0 }
  0x4a   : > { %168 = sbr.rel (%p1274_p5) target bundleno = 1145 (0x479), region = 32  ;;  %s725_s22 = sshll.u32 (!%p1274_p5), %s1166_s30, 3 }
  0x4b   : > { %s171_s6 = scalar_lea.sflag (!%p1274_p5), [#allocation3], %s1166_s30  ;;  %s174_s7 = scalar_lea.vmem (!%p1274_p5), [#allocation2], %s725_s22 }
  0x51   : > { %969 = dma.done.wait (%p1275_p0), %s171_s6, 128  }
  0x52   : > { %971 = vsyncadd (%p1275_p0), %s171_s6, 4294967168  ;;  %p1276_p11 = scmp.eq.s32.totalorder %s1051_s16, 0 }
  0x54   : > { %973 = dma.done.wait (%p1276_p11), [#allocation6], 512   ;;  %p1277_p1 = pmov %p1276_p11 }
  0x55   : > { %v1000_v0 = vmov 0.0|0.0   ;;  %vm1001_vm0 = vmmov 0   ;;  %v1002_v1 = vmov 0.0   ;;  %v202_v2 = vld [vmem:[#allocation5] sm:$0xff]  ;;  %v203_v3 = vld [vmem:[#allocation5 + $0x8] sm:$0xff]  ;;  %v204_v4 = vld [vmem:[#allocation5 + $0x10] sm:$0xff] }
  0x56   : > { %975 = vsyncadd (%p1277_p1), [#allocation6], 4294966784  ;;  %784 = vmatprep.subr.bf16.mxu0 %v1000_v0  ;;  %761 = vmatprep.mubr.msk.f32.mxu0 %vm1001_vm0, %v1002_v1  ;;  %v785_v5 = vpack.c.bf16 %v203_v3, %v202_v2  ;;  %v205_v6 = vld [vmem:[#allocation5 + $0x18] sm:$0xff]  ;;  %vm213_vm1 = vcmask 261120   ;;  %v728_v9 = vld [vmem:[%s1262_s2] ss:$0 sm:$0xff] }
  0x57   : > { %764 = vmatprep.subr.mxu1 %v1002_v1  ;;  %766 = vmatprep.mubr.msk.f32.mxu1 %vm1001_vm0, %v1002_v1  ;;  %v788_v7 = vpack.c.bf16 %v205_v6, %v204_v4  ;;  %v201_v8 = vld [vmem:[%s174_s7] sm:$0xff]  ;;  %s1003_s4 = smov 112   ;;  %s1004_s25 = smov 96   ;;  %vm290_vm2 = vcmask 130048   ;;  %vm365_vm3 = vcmask 64512  }
  0x58   : > { %786 = vmatpush3.bf16.msra.mxu0 %v785_v5  ;;  %s1005_s26 = smov 80   ;;  %s1006_s5 = smov 48  }
  0x59   : > { %787 = vmatprep.subr.bf16.mxu0 %v1000_v0  ;;  %s1007_s8 = smov 64   ;;  %s1008_s9 = smov 16  }
  0x5a   : > { %s737_s10 = sshll.u32 %s1051_s16, 7  ;;  %s200_s11 = scalar_lea.vmem [#allocation7], %s725_s22 }
  0x5b   : > { %s638_s27 = sshll.u32 %s200_s11, 4  ;;  %s1214_s23 = scalar_lea.hbm %s1263_s3, %s737_s10  ;;  %s1216_s27 = int_to_ptr.vmem [resolvable:$true] %s638_s27 }
  0x5c   : > { %789 = vmatpush3.bf16.msra.mxu0 %v788_v7  ;;  %s625_s16 = scalar_lea.sflag [#allocation4], %s1166_s30  ;;  %s924_s22 = scalar_lea.vmem %s1216_s27, 128 }
  0x5d   : > { %774 = vmatprep.subr.mxu0 %v1002_v1  ;;  %p925_p4 = scmp.ne.s32.totalorder %s1216_s27, %s924_s22  ;;  %s1009_s6 = smov [#allocation7]  }
  0x5e   : > { %s928_s7 = sshll.u32 %s1009_s6, 4  ;;  %s929_s7 = int_to_ptr.vmem [resolvable:$false] %s928_s7 }
  0x5f   : > { %762 = vmatmul.mubr.msk.f32.vlgmr.msra.gmra.mrb[0].mxu0 %vm213_vm1, %v201_v8  ;;  %p926_p6 = pnand %p925_p4, %p1121_p12  ;;  %s930_s18 = scalar_lea.vmem %s929_s7, 256 }
  0x60   : > { %776 = vmatprep.mubr.msk.f32.mxu0 %vm1001_vm0, %v1002_v1  ;;  %p931_p10 = scmp.lt.s32.totalorder %s1216_s27, %s929_s7  ;;  %p932_p13 = scmp.lt.s32.totalorder %s930_s18, %s924_s22 }
  0x61   : > { %p927_p8 = pneg %p926_p6 }
  0x62   : > { %p933_p3 = por %p932_p13, %p931_p10 }
  0x64   : > { %p934_p7 = pnand %p933_p3, %p927_p8 }
 0x132   : > { %v283_v10 = vpop.f32.mrb[0].mxu0 }
 0x133   : > { %v284_v11 = vadd.f32 %v728_v9, %v283_v10  ;;  %v763_v12 = vpop.f32.mrb[1].mxu0 }
 0x135   : > { %453 = vrot.lane.b32.xlu1 %v284_v11, %s1003_s4  ;;  %288 = vrot.lane.b32.xlu0 %v284_v11, %s1004_s25 }
 0x139   : > { %455 = vrot.lane.b32.xlu0 %v284_v11, %s1005_s26 }
 0x1a7   : > { %v289_v13 = vpop.permute.xlu0 %288  ;;  %v454_v15 = vpop.permute.xlu1 %453 }
 0x1a8   : > { %765 = vmatpush3.xpose.msk.msra.mxu1 %vm290_vm2, %v289_v13 }
 0x1a9   : > { %769 = vmatprep.subr.mxu1 %v1002_v1 }
 0x1ab   : > { %767 = vmatmul.mubr.msk.f32.vlgmr.msra.gmra.mrb[0].mxu1 %vm290_vm2, %v284_v11  ;;  %v456_v14 = vpop.permute.xlu0 %455 }
 0x1ac   : > { %775 = vmatpush3.xpose.msk.msra.mxu0 %vm290_vm2, %v456_v14  ;;  %771 = vmatprep.mubr.msk.f32.mxu1 %vm1001_vm0, %v1002_v1 }
 0x1af   : > { %777 = vmatmul.mubr.msk.f32.vlgmr.msra.gmra.mrb[2].mxu0 %vm290_vm2, %v454_v15 }
 0x27e   : > { %v361_v16 = vpop.f32.mrb[0].mxu1 }
 0x27f   : > { %v768_v17 = vpop.f32.mrb[1].mxu1  ;;  %v366_v18 = vsel %vm365_vm3, %v361_v16, -inf }
 0x280   : > { %367 = vmax.xlane.f32.xlu1 %v366_v18 }
 0x282   : > { %v527_v19 = vpop.f32.mrb[2].mxu0 }
 0x283   : > { %v778_v20 = vpop.f32.mrb[3].mxu0  ;;  %v531_v21 = vsel %vm365_vm3, %v527_v19, -inf }
 0x284   : > { %532 = vmax.xlane.f32.xlu0 %v531_v21 }
 0x291   : > { %540 = vrot.lane.b32.xlu1 %v284_v11, %s1006_s5 }
 0x29a   : > { %375 = vrot.lane.b32.xlu0 %v284_v11, %s1007_s8 }
 0x30d   : > { %v368_v22 = vpop.xlane.xlu1 %367 }
 0x30e   : > { %v369_v23 = vsub.f32 %v361_v16, %v368_v22 }
 0x310   : > { %v370_v24 = vmul.f32 1.442695, %v369_v23 }
 0x311   : > { %v533_v25 = vpop.xlane.xlu0 %532  ;;  %v541_v30 = vpop.permute.xlu1 %540 }
 0x312   : > { %858 = vpow2.f32 %v370_v24  ;;  %v534_v26 = vsub.f32 %v527_v19, %v533_v25 }
 0x314   : > { %v535_v27 = vmul.f32 1.442695, %v534_v26 }
 0x315   : > { %v376_v28 = vpop.permute.xlu0 %375 }
 0x316   : > { %860 = vpow2.f32 %v535_v27  ;;  %770 = vmatpush3.msra.mxu1 %v376_v28 }
 0x317   : > { %779 = vmatprep.subr.mxu1 %v1002_v1 }
 0x31c   : > { %v859_v29 = vpop.eup %858 }
 0x31d   : > { %772 = vmatmul.mubr.msk.f32.vlgmr.msra.gmra.mrb[2].mxu1 %vm365_vm3, %v859_v29  ;;  %v372_v31 = vsel %vm365_vm3, %v859_v29, 0.0 }
 0x31e   : > { %780 = vmatpush3.msra.mxu1 %v541_v30  ;;  %373 = vadd.xlane.f32.xlu0 %v372_v31 }
 0x31f   : > { %781 = vmatprep.mubr.msk.f32.mxu1 %vm1001_vm0, %v1002_v1 }
 0x320   : > { %v861_v32 = vpop.eup %860 }
 0x321   : > { %782 = vmatmul.mubr.msk.f32.vlgmr.msra.gmra.mrb[4].mxu1 %vm365_vm3, %v861_v32  ;;  %v537_v33 = vsel %vm365_vm3, %v861_v32, 0.0 }
 0x322   : > { %538 = vadd.xlane.f32.xlu1 %v537_v33 }
 0x3ab   : > { %v374_v41 = vpop.xlane.xlu0 %373 }
 0x3af   : > { %v539_v34 = vpop.xlane.xlu1 %538 }
 0x3b0   : > { %862 = vrcp.f32 %v539_v34 }
 0x3b1   : > { %864 = vrcp.f32 %v374_v41 }
 0x3ba   : > { %v863_v37 = vpop.eup %862 }
 0x3bb   : > { %v865_v42 = vpop.eup %864 }
 0x3f0   : > { %v447_v35 = vpop.f32.mrb[2].mxu1 }
 0x3f1   : > { %v773_v36 = vpop.f32.mrb[3].mxu1  ;;  %v452_v43 = vmul.f32 %v865_v42, %v447_v35 }
 0x3f4   : > { %v612_v38 = vpop.f32.mrb[4].mxu1 }
 0x3f5   : > { %v617_v39 = vmul.f32 %v863_v37, %v612_v38  ;;  %v783_v40 = vpop.f32.mrb[5].mxu1 }
 0x3f7   : > { %619 = vrot.lane.b32.xlu0 %v617_v39, %s1008_s9 }
 0x469   : > { %v620_v44 = vpop.permute.xlu0 %619 }
 0x46a   : > { %v622_v45 = vsel %vm290_vm2, %v452_v43, %v620_v44 }
 0x46b   : > { %623 = vst.msk [vmem:[%s200_s11] sm:$0xff] %vm213_vm1, %v622_v45 }
 0x46c   : > { %937 = shalt.err (!%p934_p7)
}
 0x46d   : > { %s938_s30 = scalar_lea.hbm %s1214_s23, 128  ;;  %s942_s25 = scalar_lea.hbm %s1263_s3, 256 }
 0x46e   : > { %p939_p9 = scmp.ne.s32.totalorder %s1214_s23, %s938_s30  ;;  %p943_p0 = scmp.lt.u32.totalorder %s1214_s23, %s1263_s3 }
 0x46f   : > { %p944_p11 = scmp.lt.u32.totalorder %s942_s25, %s938_s30  ;;  %p946_p4 = scmp.lt.u32.totalorder %s938_s30, %s1214_s23 }
 0x470   : > { %p940_p2 = pnand %p939_p9, %p1121_p12 }
 0x471   : > { %p945_p1 = por %p944_p11, %p943_p0 }
 0x472   : > { %p941_p5 = pneg %p940_p2 }
 0x473   : > { %p947_p6 = por %p946_p4, %p945_p1 }
 0x475   : > { %p948_p8 = pnand %p947_p6, %p941_p5 }
 0x477   : > { %951 = shalt.err (!%p948_p8)
}
 0x478   : > { %796 = dma.vmem_to_hbm [thread:$0]  (%p1121_p12), %s1216_s27, 128, %s1214_s23, %s625_s16  }
 0x479 PF: > { %s650_s8 = sand.u32 1, %s982_s12   ;;  %p1278_p10 = scmp.ne.s32.totalorder %s1268_s19, 0 }
 0x47a   : > { %p1279_p13 = scmp.ge.s32.totalorder %s994_s15, 2  ;;  %s651_s9 = scalar_lea.sflag [#allocation4], %s650_s8 }
 0x47c   : > { %p807_p3 = pnand %p1279_p13, %p1278_p10 }
 0x47e   : > { %977 = dma.done.wait (!%p807_p3), %s651_s9, 128  }
 0x47f   : > { %979 = vsyncadd (!%p807_p3), %s651_s9, 4294967168  ;;  %p17_p7 = scmp.ge.s32.totalorder %s1086_s24, 4   ;;  %s1280_s12 = smov %s986_s13 }
 0x480   : > { %s1281_s13 = smov %s990_s14  ;;  %s1282_s14 = smov %s1117_s17 }
 0x481   : > { %s1283_s15 = smov %s1086_s24  ;;  %19 = sbr.rel (!%p17_p7) target bundleno = 6 (0x6), region = 81 }
 0x488   :  { %656 = vsyncpa [#allocation3], 1 }
 0x489   :  { %658 = vsyncpa [#allocation3 + $0x1], 1 }
 0x48a   :  { %659 = vsyncpa [#allocation6], 1 }
 0x48b   :  { %660 = vsyncpa [#allocation4], 1 }
 0x48c   :  { %662 = vsyncpa [#allocation4 + $0x1], 1 }

</bundles_post_ra>
